<compile_context>
chip_gen: v6e
topology: v6e:2x2x1
jax: 0.10.0
libtpu: 0.0.40
codegen_flags: <defaults>
</compile_context>

<pallas_src>
import functools

import jax
import jax.numpy as jnp
from jax import lax
from jax.experimental import pallas as pl
from jax.experimental.pallas import tpu as pltpu


def _cdiv(a, b):
    return (a + b - 1) // b


def _round_up(x, m):
    return _cdiv(x, m) * m


# ---------------------------------------------------------------------------
# Fused kernel: E -> (G2[:, :3] o E composed) -> G1 -> masked |.| partial sums
# ---------------------------------------------------------------------------
def _fused_cyclic_loss_kernel(
        x_ref,        # (3, TM)     input tile, channels-first (per sample)
        wsm_ref,      # (H, 5)      packed [W_e^T | b_e | b_comp]
        wc_ref,       # (H, H)      composed (G2[:, :3] o E)^T
        wg1_ref,      # (3, H+1)    packed [W_g1[:, :3]^T | b_g1[:3]]
        acc_ref,      # (3, CHUNK)  per-partition partial-sum accumulator (output)
        *, hw, tm, chunk, t0, t_total, needs_mask):
    p = pl.program_id(0)          # megacore partition
    b = pl.program_id(1)          # batch index
    i = pl.program_id(2)          # hw-tile index within partition

    hidden = wc_ref.shape[0]
    n_chunks = tm // chunk

    # Zero the (resident) partial-sum block once per partition.
    @pl.when(jnp.logical_and(b == 0, i == 0))
    def _init():
        acc_ref[...] = jnp.zeros_like(acc_ref)

    # Unpack the (tiny, VMEM-resident) weights.
    wsm = wsm_ref[...]
    w_e = wsm[:, 0:3]                       # (H, 3)
    b_e = wsm[:, 3:4]                       # (H, 1)
    b_c = wsm[:, 4:5]                       # (H, 1)
    w_c = wc_ref[...]                       # (H, H)
    wg1 = wg1_ref[...]
    w_g1 = wg1[:, 0:hidden]                 # (3, H)
    b_g1 = wg1[:, hidden:hidden + 1]        # (3, 1)

    g = p * t0 + i                          # global hw-tile index (traced)
    tile_base = g * tm

    def chunk_err(xs):                      # xs: (3, chunk)
        # E(real1): MXU dot (K=3; MXU has slack, VALU is the binding slot).
        h1 = jnp.maximum(
            jnp.dot(w_e, xs, preferred_element_type=jnp.float32) + b_e, 0.0)
        # Composed G2[:, :3] o E.
        h2 = jnp.maximum(
            jnp.dot(w_c, h1, preferred_element_type=jnp.float32) + b_c, 0.0)
        # G1 BGR channels.
        c1 = jnp.dot(w_g1, h2, preferred_element_type=jnp.float32) + b_g1
        return jnp.abs(c1 - xs)             # (3, chunk)

    def make_body(masked):
        def body(ci, carry):
            off = ci * chunk
            if not isinstance(off, int):
                off = pl.multiple_of(off, chunk)
            xs = x_ref[:, pl.ds(off, chunk)]
            err = chunk_err(xs)
            if masked:
                col = (tile_base + off
                       + lax.broadcasted_iota(jnp.int32, (1, chunk), 1))
                err = jnp.where(col < hw, err, 0.0)   # mask before accumulation
            acc_ref[...] += err                        # lane-wide VPU adds
            return carry
        return body

    def run(masked):
        body = make_body(masked)
        if n_chunks == 1:
            body(0, 0)
        else:
            lax.fori_loop(0, n_chunks, body, 0)

    if needs_mask:
        tile_full = (g + 1) * tm <= hw       # also False for phantom tiles

        @pl.when(tile_full)
        def _fast():
            run(masked=False)

        @pl.when(jnp.logical_not(tile_full))
        def _tail():
            run(masked=True)
    else:
        run(masked=False)


# ---------------------------------------------------------------------------
# Wrapper
# ---------------------------------------------------------------------------
def cyclic_loss_forward(real1, params):
    """Forward of cyclic_loss with synthetic 1x1-conv E/G1/G2 and L1(mean)."""
    w_e, b_e, w_g1, b_g1, w_g2, b_g2 = params
    n, c, h, w = real1.shape
    assert c == 3, "real1 must be a BGR image batch"
    hidden = w_e.shape[1]
    hw = h * w
    m = n * hw

    f32 = lambda a: jnp.asarray(a, jnp.float32)
    w_e, b_e, w_g1, b_g1, w_g2, b_g2 = map(f32, (w_e, b_e, w_g1, b_g1, w_g2, b_g2))

    # NCHW -> (N, 3, H*W): pure reshape, no transpose / pad / extra HBM traffic.
    x = real1.astype(jnp.float32).reshape(n, c, hw)

    # --- tiling -------------------------------------------------------------
    chunk = min(512, _round_up(hw, 128))       # inner lane-dense compute chunk
    tm = min(32768, _round_up(hw, chunk))      # per-grid-step DMA tile
    tm = _round_up(tm, chunk)
    t_total = _cdiv(hw, tm)                    # real hw tiles per image
    n_part = 2 if t_total >= 2 else 1          # v7x megacore partitions
    t0 = _cdiv(t_total, n_part)                # tiles per partition
    has_phantom = n_part * t0 > t_total        # duplicated (fully-masked) tile
    needs_mask = (hw % tm != 0) or has_phantom
    # VMEM footprint per step: ~24*tm bytes (double-buffered x tile) + a few
    # (H, chunk) chunk temporaries -- well under every generation's default
    # scoped VMEM limit, so no vmem_limit_bytes override is needed.

    # Pre-compose the linear pair G2[:, :3] -> E (no nonlinearity between):
    #   h2 = relu(W_comp_cf @ h1 + b_comp)
    w_comp = w_g2[:, :3] @ w_e                 # (H, H), channels-last
    b_comp = b_g2[:3] @ w_e + b_e              # (H,)

    # Packed channels-first weights (3 small full-block VMEM residents).
    wsm = jnp.concatenate(
        [w_e.T, b_e.reshape(hidden, 1), b_comp.reshape(hidden, 1)], axis=1)   # (H, 5)
    wc = w_comp.T                                                             # (H, H)
    wg1 = jnp.concatenate(
        [w_g1[:, :3].T, b_g1[:3].reshape(3, 1)], axis=1)                      # (3, H+1)

    if has_phantom:
        x_index = lambda p, b, i: (b, 0, jnp.minimum(p * t0 + i, t_total - 1))
    else:
        x_index = lambda p, b, i: (b, 0, p * t0 + i)
    wmap = lambda p, b, i: (0, 0)
    out_index = lambda p, b, i: (p, 0, 0)      # one resident block per partition

    kernel = functools.partial(
        _fused_cyclic_loss_kernel,
        hw=hw, tm=tm, chunk=chunk, t0=t0, t_total=t_total, needs_mask=needs_mask)

    partials = pl.pallas_call(
        kernel,
        out_shape=jax.ShapeDtypeStruct((n_part, 3, chunk), jnp.float32),
        grid_spec=pltpu.PrefetchScalarGridSpec(
            num_scalar_prefetch=0,
            grid=(n_part, n, t0),
            in_specs=[
                pl.BlockSpec((None, c, tm), x_index),          # x tile
                pl.BlockSpec((hidden, 5), wmap),               # [W_e^T|b_e|b_comp]
                pl.BlockSpec((hidden, hidden), wmap),          # W_comp^T
                pl.BlockSpec((3, hidden + 1), wmap),           # [W_g1^T|b_g1]
            ],
            out_specs=pl.BlockSpec((None, 3, chunk), out_index),
        ),
        # Leading partition axis is "parallel" (each partition owns its own
        # output block -> no race; gives 2 TCs on v7x, sequential elsewhere).
        # The batch / hw-tile axes accumulate into that block -> "arbitrary".
        compiler_params=pltpu.CompilerParams(
            dimension_semantics=("parallel", "arbitrary", "arbitrary")),
    )(x, wsm, wc, wg1)

    # TODO(synk): the 0 * criterion(cyclic_1_mask, fake_2_mask) term is dropped
    # (it contributes exactly 0 for finite inputs; PyTorch-style NaN/Inf
    # propagation from the mask channels is not reproduced).
    return jnp.sum(partials) * (1.0 / (3.0 * m))


# ---------------------------------------------------------------------------
# Main
# ---------------------------------------------------------------------------
if __name__ == "__main__":
    N, C, H, W = 2, 3, 16, 16        # real1 is a BGR image batch (NCHW)
    HIDDEN = 32

    key = jax.random.PRNGKey(0)
    k_in, k_e, k_be, k_g1, k_bg1, k_g2, k_bg2 = jax.random.split(key, 7)

    real1 = jax.random.normal(k_in, (N, C, H, W), dtype=jnp.float32)

    # Deterministic synthetic parameters (1x1-conv weights, channels-last).
    # TODO(synk): E/G1/G2/criterion are external nn.Modules in the PyTorch
    # spec; they are synthesized here as 1x1-conv nets + L1Loss(mean).
    w_e = 0.1 * jax.random.normal(k_e, (C, HIDDEN), dtype=jnp.float32)
    b_e = 0.05 * jax.random.normal(k_be, (HIDDEN,), dtype=jnp.float32)
    w_g1 = 0.1 * jax.random.normal(k_g1, (HIDDEN, 4), dtype=jnp.float32)
    b_g1 = 0.05 * jax.random.normal(k_bg1, (4,), dtype=jnp.float32)
    w_g2 = 0.1 * jax.random.normal(k_g2, (HIDDEN, 4), dtype=jnp.float32)
    b_g2 = 0.05 * jax.random.normal(k_bg2, (4,), dtype=jnp.float32)

    params = (w_e, b_e, w_g1, b_g1, w_g2, b_g2)

    loss = jax.jit(cyclic_loss_forward)(real1, params)
    loss = jax.block_until_ready(loss)

    # Pure-JAX reference (un-fused, channels-last, same math).
    x = jnp.transpose(real1, (0, 2, 3, 1)).reshape(-1, C)
    h1 = jnp.maximum(x @ w_e + b_e, 0.0)
    f2 = h1 @ w_g2 + b_g2
    h2 = jnp.maximum(f2[:, :3] @ w_e + b_e, 0.0)
    c1 = h2 @ w_g1 + b_g1
    ref = jnp.mean(jnp.abs(c1[:, :3] - x)) + 0.0 * jnp.mean(
        jnp.abs(c1[:, 3:] - f2[:, 3:]))
    assert jnp.allclose(loss, ref, rtol=1e-5, atol=1e-5), (loss, ref)

    print("KERNEL_OK")
</pallas_src>

<mosaic_0001>
module attributes {stable_mosaic.version = 11 : i64} {
  func.func @_fused_cyclic_loss_kernel(%arg0: i32, %arg1: i32, %arg2: i32, %arg3: memref<1x3x256xf32, #tpu.memory_space<vmem>>, %arg4: memref<32x5xf32, #tpu.memory_space<vmem>>, %arg5: memref<32x32xf32, #tpu.memory_space<vmem>>, %arg6: memref<3x33xf32, #tpu.memory_space<vmem>>, %arg7: memref<1x3x256xf32, #tpu.memory_space<vmem>>) attributes {dimension_semantics = [#tpu.dimension_semantics<parallel>, #tpu.dimension_semantics<arbitrary>, #tpu.dimension_semantics<arbitrary>], iteration_bounds = array<i64: 1, 2, 1>, scalar_prefetch = 0 : i64, scratch_operands = 0 : i64, tpu.core_type = #tpu.core_type<tc>, window_params = [{transform_indices = @transform_0, window_bounds = array<i64: 1, 3, 256>}, {pipeline_mode = #tpu.pipeline_mode<synchronous>, transform_indices = @transform_1, window_bounds = array<i64: 32, 5>}, {pipeline_mode = #tpu.pipeline_mode<synchronous>, transform_indices = @transform_2, window_bounds = array<i64: 32, 32>}, {pipeline_mode = #tpu.pipeline_mode<synchronous>, transform_indices = @transform_3, window_bounds = array<i64: 3, 33>}, {transform_indices = @transform_4, window_bounds = array<i64: 1, 3, 256>}]} {
    %c0_i32 = arith.constant 0 : i32
    %0 = arith.cmpi eq, %arg1, %c0_i32 : i32
    %c0_i32_0 = arith.constant 0 : i32
    %1 = arith.cmpi eq, %arg2, %c0_i32_0 : i32
    %2 = arith.andi %0, %1 : i1
    %3 = arith.extui %2 : i1 to i32
    %c0_i32_1 = arith.constant 0 : i32
    %4 = arith.cmpi ne, %3, %c0_i32_1 : i32
    scf.if %4 {
      %cst_20 = arith.constant 0.000000e+00 : f32
      %36 = vector.broadcast %cst_20 : f32 to vector<3x256xf32>
      %c0_21 = arith.constant 0 : index
      %c0_22 = arith.constant 0 : index
      %c0_23 = arith.constant 0 : index
      %37 = vector.load %arg7[%c0_21, %c0_22, %c0_23] : memref<1x3x256xf32, #tpu.memory_space<vmem>>, vector<1x3x256xf32>
      %38 = vector.shape_cast %37 : vector<1x3x256xf32> to vector<3x256xf32>
      %39 = vector.shape_cast %36 : vector<3x256xf32> to vector<1x3x256xf32>
      tpu.vector_store %arg7[%c0_21, %c0_22, %c0_23], %39 {strides = array<i32>} : memref<1x3x256xf32, #tpu.memory_space<vmem>>, vector<1x3x256xf32>,
    } else {
    }
    %c0 = arith.constant 0 : index
    %c0_2 = arith.constant 0 : index
    %5 = vector.load %arg4[%c0, %c0_2] : memref<32x5xf32, #tpu.memory_space<vmem>>, vector<32x5xf32>
    %6 = vector.extract_strided_slice %5 {offsets = [0, 0], sizes = [32, 3], strides = [1, 1]} : vector<32x5xf32> to vector<32x3xf32>
    %7 = vector.extract_strided_slice %5 {offsets = [0, 3], sizes = [32, 1], strides = [1, 1]} : vector<32x5xf32> to vector<32x1xf32>
    %8 = vector.extract_strided_slice %5 {offsets = [0, 4], sizes = [32, 1], strides = [1, 1]} : vector<32x5xf32> to vector<32x1xf32>
    %c0_3 = arith.constant 0 : index
    %c0_4 = arith.constant 0 : index
    %9 = vector.load %arg5[%c0_3, %c0_4] : memref<32x32xf32, #tpu.memory_space<vmem>>, vector<32x32xf32>
    %c0_5 = arith.constant 0 : index
    %c0_6 = arith.constant 0 : index
    %10 = vector.load %arg6[%c0_5, %c0_6] : memref<3x33xf32, #tpu.memory_space<vmem>>, vector<3x33xf32>
    %11 = vector.extract_strided_slice %10 {offsets = [0, 0], sizes = [3, 32], strides = [1, 1]} : vector<3x33xf32> to vector<3x32xf32>
    %12 = vector.extract_strided_slice %10 {offsets = [0, 32], sizes = [3, 1], strides = [1, 1]} : vector<3x33xf32> to vector<3x1xf32>
    %c0_7 = arith.constant 0 : index
    %c0_8 = arith.constant 0 : index
    %c0_9 = arith.constant 0 : index
    %13 = vector.load %arg3[%c0_7, %c0_8, %c0_9] : memref<1x3x256xf32, #tpu.memory_space<vmem>>, vector<1x3x256xf32>
    %14 = vector.shape_cast %13 : vector<1x3x256xf32> to vector<3x256xf32>
    %cst = arith.constant dense<0.000000e+00> : vector<32x256xf32>
    %15 = tpu.matmul %6, %14, %cst {dimension_numbers = #tpu.dot_dimension_numbers<[1], [0], [0], [1], [0, 0, 1, 1], [], []>} : vector<32x3xf32>, vector<3x256xf32>, vector<32x256xf32> -> vector<32x256xf32>
    %16 = vector.broadcast %7 : vector<32x1xf32> to vector<32x256xf32>
    %17 = arith.addf %15, %16 : vector<32x256xf32>
    %cst_10 = arith.constant 0.000000e+00 : f32
    %18 = vector.broadcast %cst_10 : f32 to vector<32x256xf32>
    %19 = arith.maximumf %17, %18 : vector<32x256xf32>
    %cst_11 = arith.constant dense<0.000000e+00> : vector<32x256xf32>
    %20 = tpu.matmul %9, %19, %cst_11 {dimension_numbers = #tpu.dot_dimension_numbers<[1], [0], [0], [1], [0, 0, 1, 1], [], []>} : vector<32x32xf32>, vector<32x256xf32>, vector<32x256xf32> -> vector<32x256xf32>
    %21 = vector.broadcast %8 : vector<32x1xf32> to vector<32x256xf32>
    %22 = arith.addf %20, %21 : vector<32x256xf32>
    %cst_12 = arith.constant 0.000000e+00 : f32
    %23 = vector.broadcast %cst_12 : f32 to vector<32x256xf32>
    %24 = arith.maximumf %22, %23 : vector<32x256xf32>
    %cst_13 = arith.constant dense<0.000000e+00> : vector<3x256xf32>
    %25 = tpu.matmul %11, %24, %cst_13 {dimension_numbers = #tpu.dot_dimension_numbers<[1], [0], [0], [1], [0, 0, 1, 1], [], []>} : vector<3x32xf32>, vector<32x256xf32>, vector<3x256xf32> -> vector<3x256xf32>
    %26 = vector.broadcast %12 : vector<3x1xf32> to vector<3x256xf32>
    %27 = arith.addf %25, %26 : vector<3x256xf32>
    %28 = arith.subf %27, %14 : vector<3x256xf32>
    %29 = math.absf %28 : vector<3x256xf32>
    %c0_14 = arith.constant 0 : index
    %c0_15 = arith.constant 0 : index
    %c0_16 = arith.constant 0 : index
    %30 = vector.load %arg7[%c0_14, %c0_15, %c0_16] : memref<1x3x256xf32, #tpu.memory_space<vmem>>, vector<1x3x256xf32>
    %31 = vector.shape_cast %30 : vector<1x3x256xf32> to vector<3x256xf32>
    %32 = arith.addf %31, %29 : vector<3x256xf32>
    %c0_17 = arith.constant 0 : index
    %c0_18 = arith.constant 0 : index
    %c0_19 = arith.constant 0 : index
    %33 = vector.load %arg7[%c0_17, %c0_18, %c0_19] : memref<1x3x256xf32, #tpu.memory_space<vmem>>, vector<1x3x256xf32>
    %34 = vector.shape_cast %33 : vector<1x3x256xf32> to vector<3x256xf32>
    %35 = vector.shape_cast %32 : vector<3x256xf32> to vector<1x3x256xf32>
    tpu.vector_store %arg7[%c0_17, %c0_18, %c0_19], %35 {strides = array<i32>} : memref<1x3x256xf32, #tpu.memory_space<vmem>>, vector<1x3x256xf32>,
    return
  }
  func.func @transform_0(%arg0: i32, %arg1: i32, %arg2: i32) -> (i32, i32, i32) {
    %c1_i32 = arith.constant 1 : i32
    %0 = arith.muli %arg0, %c1_i32 : i32
    %1 = arith.addi %0, %arg2 : i32
    %c0_i32 = arith.constant 0 : i32
    %c0_i32_0 = arith.constant 0 : i32
    return %arg1, %c0_i32, %1 : i32, i32, i32
  }
  func.func @transform_1(%arg0: i32, %arg1: i32, %arg2: i32) -> (i32, i32) {
    %c0_i32 = arith.constant 0 : i32
    %c0_i32_0 = arith.constant 0 : i32
    %c0_i32_1 = arith.constant 0 : i32
    return %c0_i32, %c0_i32_0 : i32, i32
  }
  func.func @transform_2(%arg0: i32, %arg1: i32, %arg2: i32) -> (i32, i32) {
    %c0_i32 = arith.constant 0 : i32
    %c0_i32_0 = arith.constant 0 : i32
    %c0_i32_1 = arith.constant 0 : i32
    return %c0_i32, %c0_i32_0 : i32, i32
  }
  func.func @transform_3(%arg0: i32, %arg1: i32, %arg2: i32) -> (i32, i32) {
    %c0_i32 = arith.constant 0 : i32
    %c0_i32_0 = arith.constant 0 : i32
    %c0_i32_1 = arith.constant 0 : i32
    return %c0_i32, %c0_i32_0 : i32, i32
  }
  func.func @transform_4(%arg0: i32, %arg1: i32, %arg2: i32) -> (i32, i32, i32) {
    %c0_i32 = arith.constant 0 : i32
    %c0_i32_0 = arith.constant 0 : i32
    %c0_i32_1 = arith.constant 0 : i32
    return %arg0, %c0_i32, %c0_i32_0 : i32, i32, i32
  }
}

</mosaic_0001>

<bundles_post_ra>
// kernel: cyclic_loss_forward.1
= control target key start
LH: loop header
LB: loop body
LE: loop exit
PB: predicated region body
PF: predicated region fallthrough
CT: control target
= control target key end

     0   :  { %s789_s15 = smov 0   ;;  %s791_s16 = smov 0   ;;  %s883_s0 = inlined_call_operand.vmem [shape: f32[2,3,256], index: 0, kind: input, shape index: {}]   ;;  %s884_s1 = inlined_call_operand.vmem [shape: f32[32,5], index: 1, kind: input, shape index: {}]   ;;  %s885_s2 = inlined_call_operand.vmem [shape: f32[32,32], index: 2, kind: input, shape index: {}]   ;;  %s886_s3 = inlined_call_operand.vmem [shape: f32[3,33], index: 3, kind: input, shape index: {}]   ;;  %s887_s4 = inlined_call_operand.vmem [shape: f32[1,3,256], index: 4, kind: output, shape index: {}]  }
   0x1   :  { %s793_s17 = smov 0  }
   0x2 LB: > { %s29_s18 = sadd.s32 1, %s753_s16  ;;  %p679_p0 = scmp.ge.s32.totalorder %s757_s17, 1  ;;  %s757_s17 = sphi %s793_s17, %s14_s17   ;;  %s753_s16 = sphi %s791_s16, %s889_s16   ;;  %s749_s15 = sphi %s789_s15, %s888_s15  }
   0x3   : > { %p31_p1 = scmp.ge.s32.totalorder %s29_s18, 2  ;;  %p192_p2 = scmp.lt.s32.totalorder %s757_s17, 3 }
   0x5   : > { %s891_s18 = smov (%p31_p1, %s29_s18), 0  ;;  %p193_p3 = pnand %p679_p0, %p192_p2 }
   0x6   : > { %p225_p4 = scmp.lt.s32.totalorder (!%p193_p3), %s749_s15, 1  ;;  %p240_p5 = scmp.eq.s32.totalorder (!%p193_p3), %s749_s15, 0 }
   0x7   : > { %196 = sbr.rel (%p193_p3) target bundleno = 666 (0x29a), region = 36 }
   0xc   : > { %s893_s15 = smov (!%p225_p4, %s749_s15), 1  ;;  %245 = sbr.rel (!%p240_p5) target bundleno = 17 (0x11), region = 40  ;;  %v759_v0 = vmov (%p240_p5), 0.0  }
   0xd   : > { %s697_s19 = sshll.u32 %s893_s15, 3  ;;  %246 = vst [vmem:[%s887_s4] sm:$0x77] (%p240_p5), %v759_v0 }
   0xe   : > { %s232_s22 = scalar_lea.vmem %s883_s0, %s697_s19 }
  0x11 PF: > { %v813_v1 = vld [vmem:[%s232_s22] sm:$0x77]  ;;  %vm288_vm0 = vcmask 1042432   ;;  %v760_v3 = vmov 0.0   ;;  %vm279_vm1 = vcmask 23552   ;;  %v248_v5 = vld [vmem:[%s884_s1 + $0x8] sm:$0xff] }
  0x12   : > { %v817_v2 = vcombine.high %v813_v1, %v813_v1  ;;  %357 = vmatprep.mubr.f32.mxu0 %v760_v3  ;;  %483 = vmatprep.mubr.f32.mxu1 %v760_v3  ;;  %v247_v4 = vld [vmem:[%s884_s1] sm:$0xff]  ;;  %v761_v6 = vmov 3   ;;  %v250_v7 = vld [vmem:[%s884_s1 + $0x18] sm:$0xff]  ;;  %v249_v8 = vld [vmem:[%s884_s1 + $0x10] sm:$0xff]  ;;  %v762_v9 = vmov 4   ;;  %vm406_vm2 = vcmask 261120  }
  0x13   : > { %729 = vset.pattern.permute.xlu1 %v761_v6  ;;  %728 = vset.pattern.permute.xlu0 %v761_v6  ;;  %v251_v38 = vld [vmem:[%s885_s2] sm:$0xff]  ;;  %v252_v39 = vld [vmem:[%s885_s2 + $0x8] sm:$0xff]  ;;  %v253_v40 = vld [vmem:[%s885_s2 + $0x10] sm:$0xff]  ;;  %v763_v43 = vmov 32  }
  0x14   : > { %683 = vmatprep.subr.msk.mxu0 %vm288_vm0, %v817_v2  ;;  %264 = vperm.xlu1 %729, %v248_v5   ;;  %v254_v41 = vld [vmem:[%s885_s2 + $0x18] sm:$0xff]  ;;  %v255_v42 = vld [vmem:[%s886_s3] sm:$0x7] }
  0x15   : > { %684 = vmatpush1.msk.msra.mxu0 %vm288_vm0, %v813_v1  ;;  %274 = vperm.xlu0 %728, %v250_v7  }
  0x16   : > { %685 = vmatmul.mubr.msk.f32.vlgmr.msra.gmra.mxu0 %vm279_vm1, %v247_v4 }
  0x17   : > { %363 = vmatprep.mubr.f32.mxu0 %v760_v3 }
  0x18   : > { %259 = vperm.xlu1 %729, %v247_v4  }
  0x19   : > { %269 = vperm.xlu0 %728, %v249_v8  }
  0x1a   : > { %686 = vmatmul.mubr.msk.f32.gmra.mxu0 %vm279_vm1, %v248_v5 }
  0x1b   : > { %369 = vmatprep.mubr.f32.mxu0 %v760_v3 }
  0x1c   : > { %731 = vset.pattern.permute.xlu1 %v762_v9 }
  0x1d   : > { %730 = vset.pattern.permute.xlu0 %v762_v9  ;;  %399 = vperm.xlu1 %731, %v249_v8  }
  0x1e   : > { %687 = vmatmul.mubr.msk.f32.gmra.mxu0 %vm279_vm1, %v249_v8  ;;  %403 = vperm.xlu0 %730, %v250_v7  }
  0x1f   : > { %375 = vmatprep.mubr.f32.mxu0 %v760_v3 }
  0x21   : > { %395 = vperm.xlu1 %731, %v248_v5  }
  0x22   : > { %688 = vmatmul.mubr.msk.f32.gmra.mxu0 %vm279_vm1, %v250_v7  ;;  %391 = vperm.xlu0 %730, %v247_v4  }
  0x23   : > { %587 = vmatprep.mubr.f32.mxu0 %v760_v3 }
  0x25   : > { %732 = vset.pattern.permute.xlu1 %v763_v43 }
  0x26   : > { %733 = vset.pattern.permute.xlu0 %v763_v43  ;;  %518 = vperm.xlu1 %732, %v255_v42  }
  0x8f   : > { %v265_v17 = vpop.permute.xlu1 %264 }
  0x90   : > { %v275_v14 = vpop.permute.xlu0 %274 }
  0x93   : > { %v260_v25 = vpop.permute.xlu1 %259 }
  0x94   : > { %v270_v19 = vpop.permute.xlu0 %269 }
  0x98   : > { %v400_v49 = vpop.permute.xlu1 %399 }
  0x99   : > { %v404_v51 = vpop.permute.xlu0 %403 }
  0x9c   : > { %v396_v55 = vpop.permute.xlu1 %395 }
  0x9d   : > { %v392_v59 = vpop.permute.xlu0 %391 }
  0xd6   : > { %v359_v10 = vpop.f32.mrf.mxu0 }
  0xd7   : > { %v360_v32 = vadd.f32 %v359_v10, %v260_v25  ;;  %v519_v10 = vpop.permute.xlu1 %518 }
  0xd8   : > { %v361_v11 = vpop.f32.mrf.mxu0 }
  0xd9   : > { %v362_v30 = vadd.f32 %v361_v11, %v260_v25  ;;  %v382_v37 = vmax.f32 %v360_v32, 0.0 }
  0xda   : > { %v365_v12 = vpop.f32.mrf.mxu0 }
  0xdb   : > { %v366_v28 = vadd.f32 %v365_v12, %v265_v17  ;;  %v383_v36 = vmax.f32 %v362_v30, 0.0 }
  0xdc   : > { %v367_v13 = vpop.f32.mrf.mxu0 }
  0xdd   : > { %v368_v26 = vadd.f32 %v367_v13, %v265_v17  ;;  %v384_v35 = vmax.f32 %v366_v28, 0.0 }
  0xde   : > { %v371_v15 = vpop.f32.mrf.mxu0 }
  0xdf   : > { %v372_v24 = vadd.f32 %v371_v15, %v270_v19  ;;  %v385_v34 = vmax.f32 %v368_v26, 0.0 }
  0xe0   : > { %v373_v16 = vpop.f32.mrf.mxu0 }
  0xe1   : > { %v374_v22 = vadd.f32 %v373_v16, %v270_v19  ;;  %v386_v33 = vmax.f32 %v372_v24, 0.0  ;;  %v599_v19 = vld [vmem:[%s887_s4] sm:$0x77] }
  0xe2   : > { %v377_v18 = vpop.f32.mrf.mxu0 }
  0xe3   : > { %v378_v20 = vadd.f32 %v377_v18, %v275_v14  ;;  %v387_v31 = vmax.f32 %v374_v22, 0.0 }
  0xe4   : > { %v379_v21 = vpop.f32.mrf.mxu0 }
  0xe5   : > { %v380_v23 = vadd.f32 %v379_v21, %v275_v14  ;;  %v388_v29 = vmax.f32 %v378_v20, 0.0 }
  0xe7   : > { %v389_v27 = vmax.f32 %v380_v23, 0.0 }
  0xe9   : > { %443 = vmatprep.subr.mxu1 %v389_v27 }
  0xea   : > { %444 = vmatpush1.msra.mxu1 %v388_v29 }
  0xeb   : > { %445 = vmatprep.subr.mxu1 %v387_v31 }
  0xec   : > { %446 = vmatpush1.msra.mxu1 %v386_v33 }
  0xed   : > { %447 = vmatprep.subr.mxu1 %v385_v34 }
  0xee   : > { %448 = vmatpush1.msra.mxu1 %v384_v35 }
  0xef   : > { %449 = vmatprep.subr.mxu1 %v383_v36 }
  0xf0   : > { %450 = vmatpush1.msra.mxu1 %v382_v37 }
  0xf1   : > { %689 = vmatmul.mubr.msk.f32.vlgmr.msra.gmra.mxu1 %vm406_vm2, %v251_v38 }
  0xf2   : > { %489 = vmatprep.mubr.f32.mxu1 %v760_v3 }
  0xf5   : > { %690 = vmatmul.mubr.msk.f32.gmra.mxu1 %vm406_vm2, %v252_v39 }
  0xf6   : > { %495 = vmatprep.mubr.f32.mxu1 %v760_v3 }
  0xf9   : > { %691 = vmatmul.mubr.msk.f32.gmra.mxu1 %vm406_vm2, %v253_v40 }
  0xfa   : > { %501 = vmatprep.mubr.f32.mxu1 %v760_v3 }
  0xfd   : > { %692 = vmatmul.mubr.msk.f32.gmra.mxu1 %vm406_vm2, %v254_v41 }
 0x1b1   : > { %v485_v44 = vpop.f32.mrf.mxu1 }
 0x1b2   : > { %v486_v4 = vadd.f32 %v485_v44, %v392_v59 }
 0x1b3   : > { %v487_v45 = vpop.f32.mrf.mxu1 }
 0x1b4   : > { %v488_v0 = vadd.f32 %v487_v45, %v392_v59  ;;  %v508_v9 = vmax.f32 %v486_v4, 0.0 }
 0x1b5   : > { %v491_v46 = vpop.f32.mrf.mxu1 }
 0x1b6   : > { %v492_v62 = vadd.f32 %v491_v46, %v396_v55  ;;  %v509_v8 = vmax.f32 %v488_v0, 0.0 }
 0x1b7   : > { %v493_v47 = vpop.f32.mrf.mxu1 }
 0x1b8   : > { %v494_v60 = vadd.f32 %v493_v47, %v396_v55  ;;  %v510_v7 = vmax.f32 %v492_v62, 0.0 }
 0x1b9   : > { %v497_v48 = vpop.f32.mrf.mxu1 }
 0x1ba   : > { %v498_v58 = vadd.f32 %v497_v48, %v400_v49  ;;  %v511_v6 = vmax.f32 %v494_v60, 0.0 }
 0x1bb   : > { %v499_v50 = vpop.f32.mrf.mxu1 }
 0x1bc   : > { %v500_v56 = vadd.f32 %v499_v50, %v400_v49  ;;  %v512_v5 = vmax.f32 %v498_v58, 0.0 }
 0x1bd   : > { %v503_v52 = vpop.f32.mrf.mxu1 }
 0x1be   : > { %v504_v53 = vadd.f32 %v503_v52, %v404_v51  ;;  %v513_v3 = vmax.f32 %v500_v56, 0.0 }
 0x1bf   : > { %v505_v54 = vpop.f32.mrf.mxu1 }
 0x1c0   : > { %v506_v57 = vadd.f32 %v505_v54, %v404_v51  ;;  %v514_v63 = vmax.f32 %v504_v53, 0.0 }
 0x1c2   : > { %v515_v61 = vmax.f32 %v506_v57, 0.0 }
 0x1c4   : > { %547 = vmatprep.subr.mxu0 %v515_v61 }
 0x1c5   : > { %548 = vmatpush1.msra.mxu0 %v514_v63 }
 0x1c6   : > { %549 = vmatprep.subr.mxu0 %v513_v3 }
 0x1c7   : > { %550 = vmatpush1.msra.mxu0 %v512_v5 }
 0x1c8   : > { %551 = vmatprep.subr.mxu0 %v511_v6 }
 0x1c9   : > { %552 = vmatpush1.msra.mxu0 %v510_v7 }
 0x1ca   : > { %553 = vmatprep.subr.mxu0 %v509_v8 }
 0x1cb   : > { %554 = vmatpush1.msra.mxu0 %v508_v9 }
 0x1cc   : > { %693 = vmatmul.mubr.msk.f32.vlgmr.msra.gmra.mxu0 %vm406_vm2, %v255_v42 }
 0x28c   : > { %v589_v11 = vpop.f32.mrf.mxu0 }
 0x28d   : > { %v590_v12 = vadd.f32 %v589_v11, %v519_v10 }
 0x28e   : > { %v591_v13 = vpop.f32.mrf.mxu0 }
 0x28f   : > { %v595_v14 = vsub.f32 %v590_v12, %v813_v1  ;;  %v592_v15 = vadd.f32 %v591_v13, %v519_v10 }
 0x291   : > { %v596_v16 = vsub.f32 %v592_v15, %v817_v2  ;;  %v597_v17 = vand.u32 2147483647, %v595_v14 }
 0x293   : > { %v598_v18 = vand.u32 2147483647, %v596_v16 }
 0x295   : > { %v602_v20 = vcombine.low %v597_v17, %v598_v18 }
 0x297   : > { %v604_v21 = vadd.f32 %v602_v20, %v599_v19 }
 0x299   : > { %605 = vst [vmem:[%s887_s4] sm:$0x77] %v604_v21 }
 0x29a PF: > { %s14_s17 = sadd.s32 1, %s757_s17   ;;  %s888_s15 = smov %s753_s16 }
 0x29b   : > { %p11_p6 = scmp.ge.s32.totalorder %s14_s17, 4   ;;  %s889_s16 = smov %s891_s18 }
 0x29d   :  { %13 = sbr.rel (!%p11_p6) target bundleno = 2 (0x2), region = 70 }

</bundles_post_ra>
